<compile_context>
chip_gen: v7x
topology: tpu7x:2x2x1
jax: 0.10.0
libtpu: 0.0.40
codegen_flags: <defaults>
</compile_context>

<pallas_src>
import jax
import jax.numpy as jnp
from jax.experimental import pallas as pl
from jax.experimental.pallas import tpu as pltpu


# ---------------------------------------------------------------------------
# Kernels
# ---------------------------------------------------------------------------
def _senet_kernel_3d(x_ref, w1_ref, w2_ref, o_ref):
    # x_ref/o_ref: (TB, F, D) with D a multiple of 128 -> fully lane-dense.
    x = x_ref[...]
    # Squeeze: per-field mean over the embedding dim (XLU lane reduce, f32 acc).
    z = jnp.mean(x.astype(jnp.float32), axis=-1)                              # (TB, F)
    # Excitation: two tiny dense layers with ReLU, f32 accumulation.
    a = jnp.maximum(jnp.dot(z, w1_ref[...], preferred_element_type=jnp.float32), 0.0)
    a = jnp.maximum(jnp.dot(a, w2_ref[...], preferred_element_type=jnp.float32), 0.0)
    # Re-weight: lane broadcast + single native-dtype multiply (VPU only).
    o_ref[...] = (x * a[:, :, None].astype(x.dtype)).astype(o_ref.dtype)


def _senet_kernel_2d(x_ref, pool_ref, w1_ref, w2_ref, expand_ref, o_ref):
    # x_ref/o_ref : (TB, F*D) lane-dense tiles
    # pool_ref    : (F*D, F) 0/1 matrix (sums each field's D lanes)
    # expand_ref  : (F, F*D) 0/1 matrix (broadcasts per-field scale to D lanes)
    # w1_ref      : (F, H) with the mean's 1/D already folded in by the wrapper
    x = x_ref[...]
    # Squeeze: per-field SUM via the 0/1 matmul, f32 accumulation.
    z = jnp.dot(x, pool_ref[...], preferred_element_type=jnp.float32)          # (TB, F)
    # Excitation (tiny matmuls), f32 accumulation; weights kept in native dtype.
    a = jnp.maximum(jnp.dot(z, w1_ref[...], preferred_element_type=jnp.float32), 0.0)
    a = jnp.maximum(jnp.dot(a, w2_ref[...], preferred_element_type=jnp.float32), 0.0)
    # Re-weight: expand per-field scales to (TB, F*D) directly in the output
    # dtype (expand is 0/1, so this equals `a` exactly up to the cast of `a`);
    # note: for bf16 inputs the scale is applied at bf16 precision.
    s = jnp.dot(a.astype(o_ref.dtype), expand_ref[...],
                preferred_element_type=o_ref.dtype)                            # (TB, F*D)
    o_ref[...] = (x * s).astype(o_ref.dtype)


# ---------------------------------------------------------------------------
# Tile sizing helpers
# ---------------------------------------------------------------------------
def _vmem_capacity_bytes() -> int:
    """Physical per-core VMEM; fall back to the smallest generation (v7x, 64 MiB)."""
    try:
        return int(pltpu.get_tpu_info().vmem_capacity_bytes)
    except Exception:
        return 64 * 1024 * 1024


def _round_up(x: int, m: int) -> int:
    return -(-x // m) * m


def _choose_batch_tile(batch: int, bytes_per_row: int, budget_bytes: int,
                       min_steps: int = 8) -> int:
    """Largest MXU/sublane-friendly batch tile that fits the VMEM budget while
    keeping the grid multi-step (pipelining + both v7x TensorCores)."""
    tb = max(8, budget_bytes // max(1, bytes_per_row))
    tb = min(tb, 2048)                                   # 512-2048 rows ~ HBM roofline
    tb = min(tb, max(256, -(-batch // min_steps)))       # aim for >= min_steps steps
    if tb >= 256:
        tb -= tb % 256
    else:
        tb = max(8, tb - tb % 8)
    if batch <= tb:
        return batch                                     # small problems: one step
    # Nudge so the grid length is even (balances v7x's two TensorCores).
    steps = -(-batch // tb)
    if steps >= 3 and steps % 2 == 1:
        tb_even = max(8, _round_up(-(-batch // (steps + 1)), 8))
        if tb_even < batch and (-(-batch // tb_even)) % 2 == 0:
            tb = tb_even
    return tb


# ---------------------------------------------------------------------------
# Wrapper
# ---------------------------------------------------------------------------
def senet_layer(inputs, w1, w2, *, batch_tile=None):
    """SENET forward. inputs: (B, F, D), w1: (F, H), w2: (H, F) -> (B, F, D)."""
    B, F, D = inputs.shape
    FD = F * D
    H = w1.shape[1]
    dtype = inputs.dtype
    itemsize = jnp.dtype(dtype).itemsize
    w_bytes = (w1.size + w2.size) * jnp.dtype(w1.dtype).itemsize

    use_3d = (D % 128 == 0)

    # Generation-aware VMEM budgeting (~3/4 of physical VMEM as scoped limit).
    cap = _vmem_capacity_bytes()
    vmem_limit = min((3 * cap) // 4, cap - (8 << 20))

    if use_3d:
        f_pad = _round_up(F, 8)
        row_io = f_pad * D * itemsize                    # one in or out row in VMEM
        bytes_per_row = 4 * row_io + f_pad * D * 4       # 2x2 pipelined bufs + f32 work
        const_bytes = 2 * w_bytes
        flops = 2 * B * FD + 4 * B * F * H
    else:
        fd_pad = _round_up(FD, 128)
        row_io = fd_pad * itemsize
        bytes_per_row = 4 * row_io + row_io              # 2x2 pipelined bufs + `s` tile
        const_bytes = 2 * (2 * F * fd_pad * itemsize + w_bytes)  # pool/expand/weights
        flops = 2 * B * FD * F + 4 * B * F * H + 2 * B * F * FD + B * FD

    tile_budget = max(1 << 20, vmem_limit - const_bytes - (4 << 20))
    if batch_tile is None:
        batch_tile = _choose_batch_tile(B, bytes_per_row, tile_budget)

    grid = (pl.cdiv(B, batch_tile),)
    cost = pl.CostEstimate(
        flops=int(flops),
        transcendentals=0,
        bytes_accessed=int(2 * B * FD * itemsize + w_bytes),
    )
    cparams = pltpu.CompilerParams(
        dimension_semantics=("parallel",),               # shard batch tiles across TCs
        vmem_limit_bytes=int(vmem_limit),
    )

    if use_3d:
        return pl.pallas_call(
            _senet_kernel_3d,
            out_shape=jax.ShapeDtypeStruct((B, F, D), dtype),
            grid=grid,
            in_specs=[
                pl.BlockSpec((batch_tile, F, D), lambda i: (i, 0, 0)),
                pl.BlockSpec(w1.shape, lambda i: (0, 0)),   # VMEM-resident weights
                pl.BlockSpec(w2.shape, lambda i: (0, 0)),
            ],
            out_specs=pl.BlockSpec((batch_tile, F, D), lambda i: (i, 0, 0)),
            compiler_params=cparams,
            cost_estimate=cost,
        )(inputs, w1, w2)

    # Lane-dense 2-D path for small / non-128-aligned embedding dims.
    x2 = inputs.reshape(B, FD)                            # contiguous -> layout only
    expand = jnp.repeat(jnp.eye(F, dtype=dtype), D, axis=1)   # (F, FD): 0/1
    pool = expand.T                                           # (FD, F): 0/1
    # Fold the mean's 1/D into w1 (exact in f32): relu((sum/D)@w1) == relu(sum@(w1/D)).
    w1_eff = (w1.astype(jnp.float32) * (1.0 / D)).astype(w1.dtype)

    out2 = pl.pallas_call(
        _senet_kernel_2d,
        out_shape=jax.ShapeDtypeStruct((B, FD), dtype),
        grid=grid,
        in_specs=[
            pl.BlockSpec((batch_tile, FD), lambda i: (i, 0)),
            pl.BlockSpec(pool.shape, lambda i: (0, 0)),       # VMEM-resident constants
            pl.BlockSpec(w1_eff.shape, lambda i: (0, 0)),
            pl.BlockSpec(w2.shape, lambda i: (0, 0)),
            pl.BlockSpec(expand.shape, lambda i: (0, 0)),
        ],
        out_specs=pl.BlockSpec((batch_tile, FD), lambda i: (i, 0)),
        compiler_params=cparams,
        cost_estimate=cost,
    )(x2, pool, w1_eff, w2, expand)
    return out2.reshape(B, F, D)


# ---------------------------------------------------------------------------
# Params / reference
# ---------------------------------------------------------------------------
def make_senet_params(key, fields, reduction_ratio, dtype=jnp.float32):
    """Deterministic xavier-normal init matching nn.init.xavier_normal_."""
    hidden = max(1, fields // reduction_ratio)
    k1, k2 = jax.random.split(key)
    std1 = (2.0 / (fields + hidden)) ** 0.5
    std2 = (2.0 / (hidden + fields)) ** 0.5
    w1 = (std1 * jax.random.normal(k1, (fields, hidden))).astype(dtype)
    w2 = (std2 * jax.random.normal(k2, (hidden, fields))).astype(dtype)
    return w1, w2


def senet_reference(inputs, w1, w2):
    z = jnp.mean(inputs, axis=-1)
    a = jax.nn.relu(jnp.matmul(z, w1))
    a = jax.nn.relu(jnp.matmul(a, w2))
    return inputs * a[:, :, None]


# TODO(synk): l2_reg / seed in the PyTorch module are training-time /
# init-time only and have no effect on the forward pass implemented here.

if __name__ == "__main__":
    key = jax.random.PRNGKey(0)

    # Small shapes matching the module's (batch, fields, dim) contract.
    batch, fields, dim = 2, 4, 16
    reduction_ratio = 2
    kx, kp, kx2, kx3 = jax.random.split(key, 4)
    x = jax.random.normal(kx, (batch, fields, dim), dtype=jnp.float32)
    w1, w2 = make_senet_params(kp, fields, reduction_ratio)

    out = jax.block_until_ready(senet_layer(x, w1, w2))
    ref = senet_reference(x, w1, w2)
    assert out.shape == (batch, fields, dim)
    assert jnp.allclose(out, ref, atol=1e-5, rtol=1e-5), "mismatch vs reference"

    # Exercise the batch-tiled lane-dense path (multiple grid steps + a partial
    # last tile; padded rows are never written back).
    xb = jax.random.normal(kx2, (200, fields, dim), dtype=jnp.float32)
    outb = jax.block_until_ready(senet_layer(xb, w1, w2, batch_tile=128))
    refb = senet_reference(xb, w1, w2)
    assert jnp.allclose(outb, refb, atol=1e-5, rtol=1e-5), "mismatch vs reference (tiled)"

    # Exercise the 128-aligned 3-D reduce/broadcast path (no matmul trick).
    xc = jax.random.normal(kx3, (64, fields, 128), dtype=jnp.float32)
    outc = jax.block_until_ready(senet_layer(xc, w1, w2))
    refc = senet_reference(xc, w1, w2)
    assert jnp.allclose(outc, refc, atol=1e-5, rtol=1e-5), "mismatch vs reference (3d)"

    print("KERNEL_OK")
</pallas_src>

<mosaic_0001>
module attributes {stable_mosaic.version = 11 : i64} {
  func.func @_senet_kernel_2d(%arg0: i32, %arg1: memref<2x64xf32, #tpu.memory_space<vmem>>, %arg2: memref<64x4xf32, #tpu.memory_space<vmem>>, %arg3: memref<4x2xf32, #tpu.memory_space<vmem>>, %arg4: memref<2x4xf32, #tpu.memory_space<vmem>>, %arg5: memref<4x64xf32, #tpu.memory_space<vmem>>, %arg6: memref<2x64xf32, #tpu.memory_space<vmem>>) attributes {dimension_semantics = [#tpu.dimension_semantics<parallel>], iteration_bounds = array<i64: 1>, scalar_prefetch = 0 : i64, scratch_operands = 0 : i64, tpu.core_type = #tpu.core_type<tc>, window_params = [{transform_indices = @transform_0, window_bounds = array<i64: 2, 64>}, {pipeline_mode = #tpu.pipeline_mode<synchronous>, transform_indices = @transform_1, window_bounds = array<i64: 64, 4>}, {pipeline_mode = #tpu.pipeline_mode<synchronous>, transform_indices = @transform_2, window_bounds = array<i64: 4, 2>}, {pipeline_mode = #tpu.pipeline_mode<synchronous>, transform_indices = @transform_3, window_bounds = array<i64: 2, 4>}, {pipeline_mode = #tpu.pipeline_mode<synchronous>, transform_indices = @transform_4, window_bounds = array<i64: 4, 64>}, {transform_indices = @transform_5, window_bounds = array<i64: 2, 64>}]} {
    %c0 = arith.constant 0 : index
    %c0_0 = arith.constant 0 : index
    %0 = vector.load %arg1[%c0, %c0_0] : memref<2x64xf32, #tpu.memory_space<vmem>>, vector<2x64xf32>
    %c0_1 = arith.constant 0 : index
    %c0_2 = arith.constant 0 : index
    %1 = vector.load %arg2[%c0_1, %c0_2] : memref<64x4xf32, #tpu.memory_space<vmem>>, vector<64x4xf32>
    %cst = arith.constant dense<0.000000e+00> : vector<2x4xf32>
    %2 = tpu.matmul %0, %1, %cst {dimension_numbers = #tpu.dot_dimension_numbers<[1], [0], [0], [1], [0, 0, 1, 1], [], []>} : vector<2x64xf32>, vector<64x4xf32>, vector<2x4xf32> -> vector<2x4xf32>
    %c0_3 = arith.constant 0 : index
    %c0_4 = arith.constant 0 : index
    %3 = vector.load %arg3[%c0_3, %c0_4] : memref<4x2xf32, #tpu.memory_space<vmem>>, vector<4x2xf32>
    %cst_5 = arith.constant dense<0.000000e+00> : vector<2x2xf32>
    %4 = tpu.matmul %2, %3, %cst_5 {dimension_numbers = #tpu.dot_dimension_numbers<[1], [0], [0], [1], [0, 0, 1, 1], [], []>} : vector<2x4xf32>, vector<4x2xf32>, vector<2x2xf32> -> vector<2x2xf32>
    %cst_6 = arith.constant 0.000000e+00 : f32
    %5 = vector.broadcast %cst_6 : f32 to vector<2x2xf32>
    %6 = arith.maximumf %4, %5 : vector<2x2xf32>
    %c0_7 = arith.constant 0 : index
    %c0_8 = arith.constant 0 : index
    %7 = vector.load %arg4[%c0_7, %c0_8] : memref<2x4xf32, #tpu.memory_space<vmem>>, vector<2x4xf32>
    %cst_9 = arith.constant dense<0.000000e+00> : vector<2x4xf32>
    %8 = tpu.matmul %6, %7, %cst_9 {dimension_numbers = #tpu.dot_dimension_numbers<[1], [0], [0], [1], [0, 0, 1, 1], [], []>} : vector<2x2xf32>, vector<2x4xf32>, vector<2x4xf32> -> vector<2x4xf32>
    %cst_10 = arith.constant 0.000000e+00 : f32
    %9 = vector.broadcast %cst_10 : f32 to vector<2x4xf32>
    %10 = arith.maximumf %8, %9 : vector<2x4xf32>
    %c0_11 = arith.constant 0 : index
    %c0_12 = arith.constant 0 : index
    %11 = vector.load %arg5[%c0_11, %c0_12] : memref<4x64xf32, #tpu.memory_space<vmem>>, vector<4x64xf32>
    %cst_13 = arith.constant dense<0.000000e+00> : vector<2x64xf32>
    %12 = tpu.matmul %10, %11, %cst_13 {dimension_numbers = #tpu.dot_dimension_numbers<[1], [0], [0], [1], [0, 0, 1, 1], [], []>} : vector<2x4xf32>, vector<4x64xf32>, vector<2x64xf32> -> vector<2x64xf32>
    %13 = arith.mulf %0, %12 : vector<2x64xf32>
    %c0_14 = arith.constant 0 : index
    %c0_15 = arith.constant 0 : index
    %14 = vector.load %arg6[%c0_14, %c0_15] : memref<2x64xf32, #tpu.memory_space<vmem>>, vector<2x64xf32>
    tpu.vector_store %arg6[%c0_14, %c0_15], %13 {strides = array<i32>} : memref<2x64xf32, #tpu.memory_space<vmem>>, vector<2x64xf32>,
    return
  }
  func.func @transform_0(%arg0: i32) -> (i32, i32) {
    %c0_i32 = arith.constant 0 : i32
    %c0_i32_0 = arith.constant 0 : i32
    return %arg0, %c0_i32 : i32, i32
  }
  func.func @transform_1(%arg0: i32) -> (i32, i32) {
    %c0_i32 = arith.constant 0 : i32
    %c0_i32_0 = arith.constant 0 : i32
    %c0_i32_1 = arith.constant 0 : i32
    return %c0_i32, %c0_i32_0 : i32, i32
  }
  func.func @transform_2(%arg0: i32) -> (i32, i32) {
    %c0_i32 = arith.constant 0 : i32
    %c0_i32_0 = arith.constant 0 : i32
    %c0_i32_1 = arith.constant 0 : i32
    return %c0_i32, %c0_i32_0 : i32, i32
  }
  func.func @transform_3(%arg0: i32) -> (i32, i32) {
    %c0_i32 = arith.constant 0 : i32
    %c0_i32_0 = arith.constant 0 : i32
    %c0_i32_1 = arith.constant 0 : i32
    return %c0_i32, %c0_i32_0 : i32, i32
  }
  func.func @transform_4(%arg0: i32) -> (i32, i32) {
    %c0_i32 = arith.constant 0 : i32
    %c0_i32_0 = arith.constant 0 : i32
    %c0_i32_1 = arith.constant 0 : i32
    return %c0_i32, %c0_i32_0 : i32, i32
  }
  func.func @transform_5(%arg0: i32) -> (i32, i32) {
    %c0_i32 = arith.constant 0 : i32
    %c0_i32_0 = arith.constant 0 : i32
    return %arg0, %c0_i32 : i32, i32
  }
}

</mosaic_0001>

<bundles_post_ra>
// kernel: tpu_custom_call.1
= control target key start
LH: loop header
LB: loop body
LE: loop exit
PB: predicated region body
PF: predicated region fallthrough
CT: control target
= control target key end

     0   :  { %v454_v3 = vmov 0.0|0.0   ;;  %vm455_vm0 = vmmov 0   ;;  %v456_v6 = vmov 0.0   ;;  %s544_s0 = inlined_call_operand.vmem [shape: f32[2,64], index: 0, kind: input, shape index: {}]   ;;  %s545_s1 = inlined_call_operand.vmem [shape: f32[64,4], index: 1, kind: input, shape index: {}]   ;;  %s546_s2 = inlined_call_operand.vmem [shape: f32[4,2], index: 2, kind: input, shape index: {}]   ;;  %s547_s3 = inlined_call_operand.vmem [shape: f32[2,4], index: 3, kind: input, shape index: {}]   ;;  %s548_s4 = inlined_call_operand.vmem [shape: f32[4,64], index: 4, kind: input, shape index: {}]   ;;  %s549_s5 = inlined_call_operand.hbm [shape: f32[2,64], index: 5, kind: output, shape index: {}]  }
   0x1   :  { %v22_v0 = vld [vmem:[%s545_s1] sm:$0xff]  ;;  %v23_v1 = vld [vmem:[%s545_s1 + $0x8] sm:$0xff]  ;;  %v24_v2 = vld [vmem:[%s545_s1 + $0x10] sm:$0xff]  ;;  %414 = vmatprep.subr.bf16.mxu0 %v454_v3  ;;  %396 = vmatprep.mubr.msk.f32.mxu0 %vm455_vm0, %v456_v6 }
   0x2   :  { %v415_v4 = vpack.c.bf16 %v23_v1, %v22_v0  ;;  %v25_v5 = vld [vmem:[%s545_s1 + $0x18] sm:$0xff]  ;;  %399 = vmatprep.subr.mxu1 %v456_v6  ;;  %401 = vmatprep.mubr.msk.f32.mxu1 %vm455_vm0, %v456_v6 }
   0x3   :  { %v418_v7 = vpack.c.bf16 %v25_v5, %v24_v2 }
   0x4   :  { %416 = vmatpush3.bf16.msra.mxu0 %v415_v4 }
   0x5   :  { %10 = vsyncpa [#allocation3], 0  ;;  %417 = vmatprep.subr.bf16.mxu0 %v454_v3  ;;  %v26_v8 = vld [vmem:[%s545_s1 + $0x20] sm:$0xff]  ;;  %v27_v9 = vld [vmem:[%s545_s1 + $0x28] sm:$0xff]  ;;  %vm30_vm1 = vcmask 523264   ;;  %vm109_vm2 = vcmask 1043456  }
   0x6   :  { %v421_v10 = vpack.c.bf16 %v27_v9, %v26_v8  ;;  %v28_v11 = vld [vmem:[%s545_s1 + $0x30] sm:$0xff]  ;;  %v29_v12 = vld [vmem:[%s545_s1 + $0x38] sm:$0xff]  ;;  %v21_v14 = vld [vmem:[%s544_s0] sm:$0x3]  ;;  %vm105_vm3 = vcmask 31744   ;;  %vm189_vm4 = vcmask 1041408  }
   0x7   :  { %v424_v13 = vpack.c.bf16 %v29_v12, %v28_v11  ;;  %v104_v15 = vld [vmem:[%s546_s2] sm:$0xf]  ;;  %vm185_vm5 = vcmask 15360   ;;  %vm342_vm6 = vcmask 517120  }
   0x8   :  { %419 = vmatpush3.bf16.msra.mxu0 %v418_v7  ;;  %400 = vmatpush3.msk.msra.mxu1 %vm109_vm2, %v104_v15  ;;  %v184_v16 = vld [vmem:[%s547_s3] sm:$0x3]  ;;  %s457_s3 = smov [#allocation2]  }
   0x9   :  { %420 = vmatprep.subr.bf16.mxu0 %v454_v3  ;;  %404 = vmatprep.subr.mxu1 %v456_v6  ;;  %v264_v22 = vld [vmem:[%s548_s4] sm:$0xf]  ;;  %s350_s14 = sshll.u32 %s457_s3, 4  ;;  %s351_s14 = int_to_ptr.vmem [resolvable:$true] %s350_s14 }
   0xa   :  { %s430_s15 = scalar_lea.vmem %s351_s14, 32  ;;  %p435_p1 = scmp.lt.s32.totalorder %s351_s14, %s351_s14 }
   0xb   :  { %p431_p0 = scmp.ne.s32.totalorder %s351_s14, %s430_s15  ;;  %p436_p2 = scmp.lt.s32.totalorder %s430_s15, %s430_s15 }
   0xc   :  { %422 = vmatpush3.bf16.msra.mxu0 %v421_v10 }
   0xd   :  { %423 = vmatprep.subr.bf16.mxu0 %v454_v3  ;;  %p437_p3 = por %p436_p2, %p435_p1 }
   0xf   :  { %p438_p4 = pnand %p437_p3, %p431_p0 }
  0x10   :  { %425 = vmatpush3.bf16.msra.mxu0 %v424_v13 }
  0x13   :  { %397 = vmatmul.mubr.msk.f32.vlgmr.msra.gmra.mrb[0].mxu0 %vm30_vm1, %v21_v14 }
  0xe6   :  { %v100_v17 = vpop.f32.mrb[0].mxu0 }
  0xe7   :  { %v398_v18 = vpop.f32.mrb[1].mxu0  ;;  %402 = vmatmul.mubr.msk.f32.vlgmr.msra.gmra.mrb[0].mxu1 %vm105_vm3, %v100_v17 }
  0xe8   :  { %405 = vmatpush3.msk.msra.mxu1 %vm189_vm4, %v184_v16  ;;  %406 = vmatprep.mubr.msk.f32.mxu1 %vm455_vm0, %v456_v6 }
  0xe9   :  { %409 = vmatprep.subr.mxu1 %v456_v6 }
 0x1ba   :  { %v179_v19 = vpop.f32.mrb[0].mxu1 }
 0x1bb   :  { %v183_v20 = vmax.f32 %v179_v19, 0.0  ;;  %v403_v21 = vpop.f32.mrb[1].mxu1 }
 0x1bd   :  { %407 = vmatmul.mubr.msk.f32.vlgmr.msra.gmra.mrb[2].mxu1 %vm185_vm5, %v183_v20 }
 0x1be   :  { %410 = vmatpush3.msk.msra.mxu1 %vm109_vm2, %v264_v22  ;;  %411 = vmatprep.mubr.msk.f32.mxu1 %vm455_vm0, %v456_v6 }
 0x290   :  { %v259_v23 = vpop.f32.mrb[2].mxu1 }
 0x291   :  { %v263_v24 = vmax.f32 %v259_v23, 0.0  ;;  %v408_v25 = vpop.f32.mrb[3].mxu1 }
 0x293   :  { %412 = vmatmul.mubr.msk.f32.vlgmr.msra.gmra.mrb[4].mxu1 %vm105_vm3, %v263_v24 }
 0x366   :  { %v337_v26 = vpop.f32.mrb[4].mxu1 }
 0x367   :  { %v341_v27 = vmul.f32 %v337_v26, %v21_v14  ;;  %v413_v28 = vpop.f32.mrb[5].mxu1 }
 0x369   :  { %343 = vst.msk [vmem:[#allocation2] sm:$0x3] %vm342_vm6, %v341_v27 }
 0x36a   :  { %441 = shalt.err (!%p438_p4)
}
 0x36b   :  { %s442_s17 = scalar_lea.hbm %s549_s5, 32 }
 0x36c   :  { %p443_p5 = scmp.ne.s32.totalorder %s549_s5, %s442_s17  ;;  %p446_p6 = scmp.lt.u32.totalorder %s442_s17, %s549_s5 }
 0x36e   :  { %p448_p7 = pnand %p446_p6, %p443_p5 }
 0x370   :  { %451 = shalt.err (!%p448_p7)
}
 0x371   :  { %353 = dma.vmem_to_hbm [thread:$0]  %s351_s14, 32, %s549_s5, [#allocation3]  }
 0x372   :  { %452 = dma.done.wait [#allocation3], 32  }
 0x373   :  { %453 = vsyncadd [#allocation3], 4294967264 }
 0x374   :  { %357 = vsyncpa [#allocation3], 1 }

</bundles_post_ra>
